<compile_context>
chip_gen: v7x
topology: tpu7x:2x2x1
jax: 0.10.0
libtpu: 0.0.40
codegen_flags: <defaults>
</compile_context>

<pallas_src>
import functools

import jax
import jax.numpy as jnp
from jax import lax
from jax.experimental import pallas as pl
from jax.experimental.pallas import tpu as pltpu


def _alignment_loss_kernel(temp_ref, zs_ref, zi_ref, zt_ref, out_ref,
                           zi_n_ref, zt_n_ref, acc_ref, *, tile_q, total_batch):
    """One query tile of SharedInformationAlignmentLoss.

    Grid axis 0 walks z_shared in tiles of `tile_q` rows.  z_img / z_txt are
    fully resident keys, L2-normalized once into VMEM scratch at step 0.
    """
    i = pl.program_id(0)

    def normalize(x):
        # x * rsqrt(max(||x||^2, eps^2)) == x / max(||x||, eps), eps=1e-12 as F.normalize
        ss = jnp.sum(x * x, axis=1, keepdims=True)
        return x * lax.rsqrt(jnp.maximum(ss, jnp.float32(1e-24)))

    @pl.when(i == 0)
    def _():
        zi_n_ref[...] = normalize(zi_ref[...].astype(jnp.float32))
        zt_n_ref[...] = normalize(zt_ref[...].astype(jnp.float32))
        acc_ref[...] = jnp.zeros_like(acc_ref)

    inv_temp = jnp.float32(1.0) / temp_ref[0]

    # Normalize the query tile and fold 1/temperature into it once.
    z_s = normalize(zs_ref[...].astype(jnp.float32)) * inv_temp

    z_i = zi_n_ref[...]
    z_t = zt_n_ref[...]

    # A . B^T without materializing a transpose: contract the feature dims.
    dn = (((1,), (1,)), ((), ()))
    sim_s_i = lax.dot_general(z_s, z_i, dimension_numbers=dn,
                              precision=lax.Precision.HIGHEST,
                              preferred_element_type=jnp.float32)
    sim_s_t = lax.dot_general(z_s, z_t, dimension_numbers=dn,
                              precision=lax.Precision.HIGHEST,
                              preferred_element_type=jnp.float32)

    # Diagonal (target) logits: per-row dot of the query tile with the key rows
    # at the same global indices -- O(tile_q * D) instead of BxB masking.
    start = pl.multiple_of(i * tile_q, tile_q)
    diag_i = jnp.sum(z_s * zi_n_ref[pl.ds(start, tile_q), :], axis=1, keepdims=True)
    diag_t = jnp.sum(z_s * zt_n_ref[pl.ds(start, tile_q), :], axis=1, keepdims=True)

    def partial_ce(sim, diag):
        # sum over this tile of (logsumexp(row) - target_logit), kept (1,1)-shaped.
        m = jnp.max(sim, axis=1, keepdims=True)
        lse = m + jnp.log(jnp.sum(jnp.exp(sim - m), axis=1, keepdims=True))
        return jnp.sum(lse - diag, axis=(0, 1), keepdims=True)

    acc_ref[...] = acc_ref[...] + partial_ce(sim_s_i, diag_i) + partial_ce(sim_s_t, diag_t)

    @pl.when(i == pl.num_programs(0) - 1)
    def _():
        # loss_s_i + loss_s_t, each a batch mean -> divide the total sum by B once.
        out_ref[...] = acc_ref[...] * jnp.float32(1.0 / total_batch)


def _pick_tile_q(b, max_tile=256):
    """Largest query tile <= max_tile that divides b (multiple of 8 when tiling)."""
    if b <= max_tile:
        return b
    for t in range(max_tile, 7, -8):
        if b % t == 0:
            return t
    return b  # fallback: whole batch as a single tile


def shared_information_alignment_loss(z_img, z_txt, z_shared, temperature=0.1):
    """Pallas wrapper: batch-tiled grid, SMEM temperature scalar, (1,1) VMEM output."""
    assert z_img.shape == z_txt.shape == z_shared.shape
    b, d = z_shared.shape
    tile_q = _pick_tile_q(b)
    num_tiles = b // tile_q

    kernel = functools.partial(_alignment_loss_kernel, tile_q=tile_q, total_batch=b)
    temp = jnp.asarray([temperature], dtype=jnp.float32)

    out = pl.pallas_call(
        kernel,
        out_shape=jax.ShapeDtypeStruct((1, 1), jnp.float32),
        grid=(num_tiles,),
        in_specs=[
            pl.BlockSpec(memory_space=pltpu.SMEM),           # temperature (1,) scalar
            pl.BlockSpec((tile_q, d), lambda i: (i, 0)),     # z_shared query tile
            pl.BlockSpec((b, d), lambda i: (0, 0)),          # z_img keys (resident)
            pl.BlockSpec((b, d), lambda i: (0, 0)),          # z_txt keys (resident)
        ],
        out_specs=pl.BlockSpec((1, 1), lambda i: (0, 0)),    # scalar loss (1,1)
        scratch_shapes=[
            pltpu.VMEM((b, d), jnp.float32),                 # normalized z_img
            pltpu.VMEM((b, d), jnp.float32),                 # normalized z_txt
            pltpu.VMEM((1, 1), jnp.float32),                 # running sum of (lse - diag)
        ],
        compiler_params=pltpu.CompilerParams(
            dimension_semantics=("arbitrary",)),             # scalar carry across query tiles
    )(temp, z_shared, z_img, z_txt)
    return out[0, 0]


def _reference_loss(z_img, z_txt, z_shared, temperature=0.1):
    """Pure-JAX reference mirroring the PyTorch forward, for a sanity check."""
    def normalize(x):
        return x / jnp.maximum(jnp.linalg.norm(x, axis=1, keepdims=True), 1e-12)

    hp = lax.Precision.HIGHEST
    z_img = normalize(z_img.astype(jnp.float32))
    z_txt = normalize(z_txt.astype(jnp.float32))
    z_shared = normalize(z_shared.astype(jnp.float32))
    sim_s_i = jnp.dot(z_shared, z_img.T, precision=hp) / temperature
    sim_s_t = jnp.dot(z_shared, z_txt.T, precision=hp) / temperature

    def ce(sim):
        lse = jax.scipy.special.logsumexp(sim, axis=1)
        diag = jnp.diagonal(sim)
        return jnp.mean(lse - diag)

    return ce(sim_s_i) + ce(sim_s_t)


if __name__ == "__main__":
    # Small-shape check (single query tile).
    k1, k2, k3 = jax.random.split(jax.random.PRNGKey(0), 3)
    batch, dim = 8, 32
    z_img = jax.random.normal(k1, (batch, dim), dtype=jnp.float32)
    z_txt = jax.random.normal(k2, (batch, dim), dtype=jnp.float32)
    z_shared = jax.random.normal(k3, (batch, dim), dtype=jnp.float32)

    loss = jax.block_until_ready(
        shared_information_alignment_loss(z_img, z_txt, z_shared, temperature=0.1))
    ref = jax.block_until_ready(
        _reference_loss(z_img, z_txt, z_shared, temperature=0.1))
    assert jnp.allclose(loss, ref, rtol=1e-4, atol=1e-4), (loss, ref)

    # Multi-tile check: exercises the grid carry, scratch persistence and the
    # dynamic diagonal slice at a nonzero offset.
    k4, k5, k6 = jax.random.split(jax.random.PRNGKey(1), 3)
    b2, d2 = 512, 128
    z_img2 = jax.random.normal(k4, (b2, d2), dtype=jnp.float32)
    z_txt2 = jax.random.normal(k5, (b2, d2), dtype=jnp.float32)
    z_shared2 = jax.random.normal(k6, (b2, d2), dtype=jnp.float32)

    loss2 = jax.block_until_ready(
        shared_information_alignment_loss(z_img2, z_txt2, z_shared2, temperature=0.07))
    ref2 = jax.block_until_ready(
        _reference_loss(z_img2, z_txt2, z_shared2, temperature=0.07))
    assert jnp.allclose(loss2, ref2, rtol=1e-4, atol=1e-4), (loss2, ref2)

    print("KERNEL_OK")
</pallas_src>

<mosaic_0001>
module attributes {stable_mosaic.version = 11 : i64} {
  func.func @_alignment_loss_kernel(%arg0: i32, %arg1: memref<1xf32, #tpu.memory_space<smem>>, %arg2: memref<8x32xf32, #tpu.memory_space<vmem>>, %arg3: memref<8x32xf32, #tpu.memory_space<vmem>>, %arg4: memref<8x32xf32, #tpu.memory_space<vmem>>, %arg5: memref<1x1xf32, #tpu.memory_space<vmem>>, %arg6: memref<8x32xf32, #tpu.memory_space<vmem>>, %arg7: memref<8x32xf32, #tpu.memory_space<vmem>>, %arg8: memref<1x1xf32, #tpu.memory_space<vmem>>) attributes {dimension_semantics = [#tpu.dimension_semantics<arbitrary>], iteration_bounds = array<i64: 1>, scalar_prefetch = 0 : i64, scratch_operands = 3 : i64, tpu.core_type = #tpu.core_type<tc>, window_params = [{transform_indices = @transform_0, window_bounds = array<i64: 1>}, {transform_indices = @transform_1, window_bounds = array<i64: 8, 32>}, {pipeline_mode = #tpu.pipeline_mode<synchronous>, transform_indices = @transform_2, window_bounds = array<i64: 8, 32>}, {pipeline_mode = #tpu.pipeline_mode<synchronous>, transform_indices = @transform_3, window_bounds = array<i64: 8, 32>}, {pipeline_mode = #tpu.pipeline_mode<synchronous>, transform_indices = @transform_4, window_bounds = array<i64: 1, 1>}]} {
    %c0_i32 = arith.constant 0 : i32
    %0 = arith.cmpi eq, %arg0, %c0_i32 : i32
    %1 = arith.extui %0 : i1 to i32
    %c0_i32_0 = arith.constant 0 : i32
    %2 = arith.cmpi ne, %1, %c0_i32_0 : i32
    scf.if %2 {
      %c0_27 = arith.constant 0 : index
      %c0_28 = arith.constant 0 : index
      %69 = vector.load %arg3[%c0_27, %c0_28] : memref<8x32xf32, #tpu.memory_space<vmem>>, vector<8x32xf32>
      %70 = arith.mulf %69, %69 : vector<8x32xf32>
      %cst_29 = arith.constant dense<0.000000e+00> : vector<8xf32>
      %71 = vector.multi_reduction <add>, %70, %cst_29 [1] : vector<8x32xf32> to vector<8xf32>
      %72 = vector.shape_cast %71 : vector<8xf32> to vector<8x1xf32>
      %cst_30 = arith.constant 1.000000e-24 : f32
      %73 = vector.broadcast %cst_30 : f32 to vector<8x1xf32>
      %74 = arith.maximumf %72, %73 : vector<8x1xf32>
      %75 = math.rsqrt %74 : vector<8x1xf32>
      %76 = vector.broadcast %75 : vector<8x1xf32> to vector<8x32xf32>
      %77 = arith.mulf %69, %76 : vector<8x32xf32>
      %c0_31 = arith.constant 0 : index
      %c0_32 = arith.constant 0 : index
      %78 = vector.load %arg6[%c0_31, %c0_32] : memref<8x32xf32, #tpu.memory_space<vmem>>, vector<8x32xf32>
      tpu.vector_store %arg6[%c0_31, %c0_32], %77 {strides = array<i32>} : memref<8x32xf32, #tpu.memory_space<vmem>>, vector<8x32xf32>,
      %c0_33 = arith.constant 0 : index
      %c0_34 = arith.constant 0 : index
      %79 = vector.load %arg4[%c0_33, %c0_34] : memref<8x32xf32, #tpu.memory_space<vmem>>, vector<8x32xf32>
      %80 = arith.mulf %79, %79 : vector<8x32xf32>
      %cst_35 = arith.constant dense<0.000000e+00> : vector<8xf32>
      %81 = vector.multi_reduction <add>, %80, %cst_35 [1] : vector<8x32xf32> to vector<8xf32>
      %82 = vector.shape_cast %81 : vector<8xf32> to vector<8x1xf32>
      %cst_36 = arith.constant 1.000000e-24 : f32
      %83 = vector.broadcast %cst_36 : f32 to vector<8x1xf32>
      %84 = arith.maximumf %82, %83 : vector<8x1xf32>
      %85 = math.rsqrt %84 : vector<8x1xf32>
      %86 = vector.broadcast %85 : vector<8x1xf32> to vector<8x32xf32>
      %87 = arith.mulf %79, %86 : vector<8x32xf32>
      %c0_37 = arith.constant 0 : index
      %c0_38 = arith.constant 0 : index
      %88 = vector.load %arg7[%c0_37, %c0_38] : memref<8x32xf32, #tpu.memory_space<vmem>>, vector<8x32xf32>
      tpu.vector_store %arg7[%c0_37, %c0_38], %87 {strides = array<i32>} : memref<8x32xf32, #tpu.memory_space<vmem>>, vector<8x32xf32>,
      %cst_39 = arith.constant 0.000000e+00 : f32
      %89 = vector.broadcast %cst_39 : f32 to vector<1x1xf32>
      %c0_40 = arith.constant 0 : index
      %c0_41 = arith.constant 0 : index
      %90 = vector.load %arg8[%c0_40, %c0_41] : memref<1x1xf32, #tpu.memory_space<vmem>>, vector<1x1xf32>
      tpu.vector_store %arg8[%c0_40, %c0_41], %89 {strides = array<i32>} : memref<1x1xf32, #tpu.memory_space<vmem>>, vector<1x1xf32>,
    } else {
    }
    %c0 = arith.constant 0 : index
    %3 = memref.load %arg1[%c0] : memref<1xf32, #tpu.memory_space<smem>>
    %cst = arith.constant 1.000000e+00 : f32
    %4 = arith.divf %cst, %3 : f32
    %c0_1 = arith.constant 0 : index
    %c0_2 = arith.constant 0 : index
    %5 = vector.load %arg2[%c0_1, %c0_2] : memref<8x32xf32, #tpu.memory_space<vmem>>, vector<8x32xf32>
    %6 = arith.mulf %5, %5 : vector<8x32xf32>
    %cst_3 = arith.constant dense<0.000000e+00> : vector<8xf32>
    %7 = vector.multi_reduction <add>, %6, %cst_3 [1] : vector<8x32xf32> to vector<8xf32>
    %8 = vector.shape_cast %7 : vector<8xf32> to vector<8x1xf32>
    %cst_4 = arith.constant 1.000000e-24 : f32
    %9 = vector.broadcast %cst_4 : f32 to vector<8x1xf32>
    %10 = arith.maximumf %8, %9 : vector<8x1xf32>
    %11 = math.rsqrt %10 : vector<8x1xf32>
    %12 = vector.broadcast %11 : vector<8x1xf32> to vector<8x32xf32>
    %13 = arith.mulf %5, %12 : vector<8x32xf32>
    %14 = vector.broadcast %4 : f32 to vector<8x32xf32>
    %15 = arith.mulf %13, %14 : vector<8x32xf32>
    %c0_5 = arith.constant 0 : index
    %c0_6 = arith.constant 0 : index
    %16 = vector.load %arg6[%c0_5, %c0_6] : memref<8x32xf32, #tpu.memory_space<vmem>>, vector<8x32xf32>
    %c0_7 = arith.constant 0 : index
    %c0_8 = arith.constant 0 : index
    %17 = vector.load %arg7[%c0_7, %c0_8] : memref<8x32xf32, #tpu.memory_space<vmem>>, vector<8x32xf32>
    %cst_9 = arith.constant dense<0.000000e+00> : vector<8x8xf32>
    %18 = tpu.matmul %15, %16, %cst_9 {dimension_numbers = #tpu.dot_dimension_numbers<[1], [1], [0], [0], [0, 0, 1, 0], [], []>, precision = #tpu.contract_precision<fp32>} : vector<8x32xf32>, vector<8x32xf32>, vector<8x8xf32> -> vector<8x8xf32>
    %cst_10 = arith.constant dense<0.000000e+00> : vector<8x8xf32>
    %19 = tpu.matmul %15, %17, %cst_10 {dimension_numbers = #tpu.dot_dimension_numbers<[1], [1], [0], [0], [0, 0, 1, 0], [], []>, precision = #tpu.contract_precision<fp32>} : vector<8x32xf32>, vector<8x32xf32>, vector<8x8xf32> -> vector<8x8xf32>
    %c8_i32 = arith.constant 8 : i32
    %20 = arith.muli %arg0, %c8_i32 : i32
    %21 = tpu.assume_multiple %20, 8 : i32
    %22 = arith.index_cast %21 : i32 to index
    %c0_11 = arith.constant 0 : index
    %23 = vector.load %arg6[%22, %c0_11] : memref<8x32xf32, #tpu.memory_space<vmem>>, vector<8x32xf32>
    %24 = arith.mulf %15, %23 : vector<8x32xf32>
    %cst_12 = arith.constant dense<0.000000e+00> : vector<8xf32>
    %25 = vector.multi_reduction <add>, %24, %cst_12 [1] : vector<8x32xf32> to vector<8xf32>
    %26 = vector.shape_cast %25 : vector<8xf32> to vector<8x1xf32>
    %27 = arith.index_cast %21 : i32 to index
    %c0_13 = arith.constant 0 : index
    %28 = vector.load %arg7[%27, %c0_13] : memref<8x32xf32, #tpu.memory_space<vmem>>, vector<8x32xf32>
    %29 = arith.mulf %15, %28 : vector<8x32xf32>
    %cst_14 = arith.constant dense<0.000000e+00> : vector<8xf32>
    %30 = vector.multi_reduction <add>, %29, %cst_14 [1] : vector<8x32xf32> to vector<8xf32>
    %31 = vector.shape_cast %30 : vector<8xf32> to vector<8x1xf32>
    %c0_15 = arith.constant 0 : index
    %c0_16 = arith.constant 0 : index
    %32 = vector.load %arg8[%c0_15, %c0_16] : memref<1x1xf32, #tpu.memory_space<vmem>>, vector<1x1xf32>
    %cst_17 = arith.constant dense<0xFF800000> : vector<8xf32>
    %33 = vector.multi_reduction <maximumf>, %18, %cst_17 [1] : vector<8x8xf32> to vector<8xf32>
    %34 = vector.shape_cast %33 : vector<8xf32> to vector<8x1xf32>
    %35 = vector.broadcast %34 : vector<8x1xf32> to vector<8x8xf32>
    %36 = arith.subf %18, %35 : vector<8x8xf32>
    %37 = math.exp %36 : vector<8x8xf32>
    %cst_18 = arith.constant dense<0.000000e+00> : vector<8xf32>
    %38 = vector.multi_reduction <add>, %37, %cst_18 [1] : vector<8x8xf32> to vector<8xf32>
    %39 = vector.shape_cast %38 : vector<8xf32> to vector<8x1xf32>
    %40 = math.log %39 : vector<8x1xf32>
    %41 = arith.addf %34, %40 : vector<8x1xf32>
    %42 = arith.subf %41, %26 : vector<8x1xf32>
    %43 = vector.shape_cast %42 : vector<8x1xf32> to vector<1x8x1xf32>
    %cst_19 = arith.constant dense<0.000000e+00> : vector<1xf32>
    %44 = vector.multi_reduction <add>, %43, %cst_19 [1, 2] : vector<1x8x1xf32> to vector<1xf32>
    %45 = vector.shape_cast %44 : vector<1xf32> to vector<1x1x1xf32>
    %46 = vector.extract %45[0, 0, 0] : f32 from vector<1x1x1xf32>
    %47 = vector.broadcast %46 : f32 to vector<1x1xf32>
    %48 = arith.addf %32, %47 : vector<1x1xf32>
    %cst_20 = arith.constant dense<0xFF800000> : vector<8xf32>
    %49 = vector.multi_reduction <maximumf>, %19, %cst_20 [1] : vector<8x8xf32> to vector<8xf32>
    %50 = vector.shape_cast %49 : vector<8xf32> to vector<8x1xf32>
    %51 = vector.broadcast %50 : vector<8x1xf32> to vector<8x8xf32>
    %52 = arith.subf %19, %51 : vector<8x8xf32>
    %53 = math.exp %52 : vector<8x8xf32>
    %cst_21 = arith.constant dense<0.000000e+00> : vector<8xf32>
    %54 = vector.multi_reduction <add>, %53, %cst_21 [1] : vector<8x8xf32> to vector<8xf32>
    %55 = vector.shape_cast %54 : vector<8xf32> to vector<8x1xf32>
    %56 = math.log %55 : vector<8x1xf32>
    %57 = arith.addf %50, %56 : vector<8x1xf32>
    %58 = arith.subf %57, %31 : vector<8x1xf32>
    %59 = vector.shape_cast %58 : vector<8x1xf32> to vector<1x8x1xf32>
    %cst_22 = arith.constant dense<0.000000e+00> : vector<1xf32>
    %60 = vector.multi_reduction <add>, %59, %cst_22 [1, 2] : vector<1x8x1xf32> to vector<1xf32>
    %61 = vector.shape_cast %60 : vector<1xf32> to vector<1x1x1xf32>
    %62 = vector.extract %61[0, 0, 0] : f32 from vector<1x1x1xf32>
    %63 = vector.broadcast %62 : f32 to vector<1x1xf32>
    %64 = arith.addf %48, %63 : vector<1x1xf32>
    %c0_23 = arith.constant 0 : index
    %c0_24 = arith.constant 0 : index
    %65 = vector.load %arg8[%c0_23, %c0_24] : memref<1x1xf32, #tpu.memory_space<vmem>>, vector<1x1xf32>
    tpu.vector_store %arg8[%c0_23, %c0_24], %64 {strides = array<i32>} : memref<1x1xf32, #tpu.memory_space<vmem>>, vector<1x1xf32>,
    %c0_i32_25 = arith.constant 0 : i32
    %66 = arith.cmpi eq, %arg0, %c0_i32_25 : i32
    %67 = arith.extui %66 : i1 to i32
    %c0_i32_26 = arith.constant 0 : i32
    %68 = arith.cmpi ne, %67, %c0_i32_26 : i32
    scf.if %68 {
      %c0_27 = arith.constant 0 : index
      %c0_28 = arith.constant 0 : index
      %69 = vector.load %arg8[%c0_27, %c0_28] : memref<1x1xf32, #tpu.memory_space<vmem>>, vector<1x1xf32>
      %cst_29 = arith.constant 1.250000e-01 : f32
      %70 = vector.broadcast %cst_29 : f32 to vector<1x1xf32>
      %71 = arith.mulf %69, %70 : vector<1x1xf32>
      %c0_30 = arith.constant 0 : index
      %c0_31 = arith.constant 0 : index
      %72 = vector.load %arg5[%c0_30, %c0_31] : memref<1x1xf32, #tpu.memory_space<vmem>>, vector<1x1xf32>
      tpu.vector_store %arg5[%c0_30, %c0_31], %71 {strides = array<i32>} : memref<1x1xf32, #tpu.memory_space<vmem>>, vector<1x1xf32>,
    } else {
    }
    return
  }
  func.func @transform_0(%arg0: i32) -> i32 {
    %c0_i32 = arith.constant 0 : i32
    %c0_i32_0 = arith.constant 0 : i32
    return %c0_i32 : i32
  }
  func.func @transform_1(%arg0: i32) -> (i32, i32) {
    %c0_i32 = arith.constant 0 : i32
    %c0_i32_0 = arith.constant 0 : i32
    return %arg0, %c0_i32 : i32, i32
  }
  func.func @transform_2(%arg0: i32) -> (i32, i32) {
    %c0_i32 = arith.constant 0 : i32
    %c0_i32_0 = arith.constant 0 : i32
    %c0_i32_1 = arith.constant 0 : i32
    return %c0_i32, %c0_i32_0 : i32, i32
  }
  func.func @transform_3(%arg0: i32) -> (i32, i32) {
    %c0_i32 = arith.constant 0 : i32
    %c0_i32_0 = arith.constant 0 : i32
    %c0_i32_1 = arith.constant 0 : i32
    return %c0_i32, %c0_i32_0 : i32, i32
  }
  func.func @transform_4(%arg0: i32) -> (i32, i32) {
    %c0_i32 = arith.constant 0 : i32
    %c0_i32_0 = arith.constant 0 : i32
    %c0_i32_1 = arith.constant 0 : i32
    return %c0_i32, %c0_i32_0 : i32, i32
  }
}

</mosaic_0001>

<bundles_post_ra>
// kernel: tpu_custom_call.1
= control target key start
LH: loop header
LB: loop body
LE: loop exit
PB: predicated region body
PF: predicated region fallthrough
CT: control target
= control target key end

     0   :  { %10 = vsyncpa [#allocation7], 0  ;;  %s1420_s0 = inlined_call_operand.<no memory space> [shape: f32[1], index: 0, kind: input, shape index: {}]   ;;  %s1421_s1 = inlined_call_operand.hbm [shape: f32[8,32], index: 1, kind: input, shape index: {}]   ;;  %s1422_s2 = inlined_call_operand.hbm [shape: f32[8,32], index: 2, kind: input, shape index: {}]   ;;  %s1423_s3 = inlined_call_operand.vmem [shape: f32[8,32], index: 3, kind: input, shape index: {}]   ;;  %s1424_s4 = inlined_call_operand.hbm [shape: f32[1,1], index: 4, kind: output, shape index: {}]  }
   0x1   :  { %11 = vsyncpa [#allocation10], 0 }
   0x2   :  { %12 = vsyncpa [#allocation8], 0  ;;  %s1279_s15 = smov [#allocation6]   ;;  %s1280_s17 = smov [#allocation9]  }
   0x3   :  { %s21_s16 = sshll.u32 %s1279_s15, 4  ;;  %s31_s18 = sshll.u32 %s1280_s17, 4  ;;  %s22_s16 = int_to_ptr.vmem [resolvable:$true] %s21_s16  ;;  %s32_s18 = int_to_ptr.vmem [resolvable:$true] %s31_s18 }
   0x4   :  { %s1207_s21 = scalar_lea.hbm %s1421_s1, 128 }
   0x5   :  { %p1208_p0 = scmp.ne.s32.totalorder %s1421_s1, %s1207_s21  ;;  %p1211_p1 = scmp.lt.u32.totalorder %s1207_s21, %s1421_s1 }
   0x7   :  { %p1213_p2 = pnand %p1211_p1, %p1208_p0 }
   0x9   :  { %1216 = shalt.err (!%p1213_p2)
}
   0xa   :  { %s1217_s26 = scalar_lea.vmem %s22_s16, 128  ;;  %p1222_p4 = scmp.lt.s32.totalorder %s22_s16, %s22_s16 }
   0xb   :  { %p1218_p3 = scmp.ne.s32.totalorder %s22_s16, %s1217_s26  ;;  %p1223_p5 = scmp.lt.s32.totalorder %s1217_s26, %s1217_s26 }
   0xd   :  { %p1224_p6 = por %p1223_p5, %p1222_p4 }
   0xf   :  { %p1225_p7 = pnand %p1224_p6, %p1218_p3 }
  0x11   :  { %1228 = shalt.err (!%p1225_p7)
}
  0x12   :  { %24 = dma.hbm_to_vmem [thread:$0]  %s1421_s1, 128, %s22_s16, [#allocation7]  }
  0x13   :  { %s1229_s5 = scalar_lea.hbm %s1422_s2, 128 }
  0x14   :  { %p1230_p8 = scmp.ne.s32.totalorder %s1422_s2, %s1229_s5  ;;  %p1233_p9 = scmp.lt.u32.totalorder %s1229_s5, %s1422_s2 }
  0x16   :  { %p1235_p10 = pnand %p1233_p9, %p1230_p8 }
  0x18   :  { %1238 = shalt.err (!%p1235_p10)
}
  0x19   :  { %s1239_s10 = scalar_lea.vmem %s32_s18, 128  ;;  %p1244_p12 = scmp.lt.s32.totalorder %s32_s18, %s32_s18 }
  0x1a   :  { %p1240_p11 = scmp.ne.s32.totalorder %s32_s18, %s1239_s10  ;;  %p1245_p13 = scmp.lt.s32.totalorder %s1239_s10, %s1239_s10 }
  0x1c   :  { %p1246_p0 = por %p1245_p13, %p1244_p12 }
  0x1e   :  { %p1247_p1 = pnand %p1246_p0, %p1240_p11 }
  0x20   :  { %1250 = shalt.err (!%p1247_p1)
}
  0x21   :  { %34 = dma.hbm_to_vmem [thread:$0]  %s1422_s2, 128, %s32_s18, [#allocation10]  }
  0x22   :  { %1273 = dma.done.wait [#allocation7], 128  }
  0x23   :  { %1274 = vsyncadd [#allocation7], 4294967168 }
  0x24   :  { %1275 = dma.done.wait [#allocation10], 128  }
  0x25   :  { %1276 = vsyncadd [#allocation10], 4294967168  ;;  %v69_v0 = vstv %s1420_s0  ;;  %vm49_vm0 = vcmask 261120   ;;  %v57_v1 = vld [vmem:[%s1423_s3] sm:$0xff]  ;;  %v72_v3 = vld [vmem:[#allocation6] sm:$0xff]  ;;  %v1281_v11 = vmov 0.0  }
  0x26   :  { %1191 = vrcp.f32 %v69_v0  ;;  %v47_v2 = vld [vmem:[#allocation9] sm:$0xff]  ;;  %v58_v4 = vmul.f32 %v57_v1, %v57_v1  ;;  %v73_v6 = vmul.f32 %v72_v3, %v72_v3  ;;  %1100 = vmatprep.subr.mxu0 %v1281_v11  ;;  %1130 = vmatprep.subr.mxu1 %v1281_v11  ;;  %vm1282_vm1 = vmmov 0   ;;  %s1283_s16 = smov [#allocation11]  }
  0x27   :  { %v48_v5 = vmul.f32 %v47_v2, %v47_v2  ;;  %1102 = vmatprep.mubr.msk.f32.mxu0 %vm1282_vm1, %v1281_v11  ;;  %1132 = vmatprep.mubr.msk.f32.mxu1 %vm1282_vm1, %v1281_v11  ;;  %vm1000_vm2 = vcmask 64512   ;;  %vm1014_vm3 = vcmask 7168   ;;  %vm66_vm4 = vcmask 0   ;;  %s1066_s17 = sshll.u32 %s1283_s16, 4  ;;  %s1067_s17 = int_to_ptr.vmem [resolvable:$true] %s1066_s17 }
  0x28   :  { %v59_v7 = vsel %vm49_vm0, %v58_v4, 0.0  ;;  %v75_v10 = vsel %vm49_vm0, %v73_v6, 0.0  ;;  %67 = vst.msk [vmem:[#allocation4] sm:$0x1] %vm66_vm4, %v1281_v11  ;;  %s1251_s18 = scalar_lea.vmem %s1067_s17, 16  ;;  %s1255_s19 = scalar_lea.vmem %s1067_s17, 32 }
  0x29   :  { %v50_v8 = vsel %vm49_vm0, %v48_v5, 0.0  ;;  %60 = vadd.xlane.f32.xlu1 %v59_v7  ;;  %p1252_p2 = scmp.ne.s32.totalorder %s1067_s17, %s1251_s18  ;;  %p1256_p3 = scmp.lt.s32.totalorder %s1067_s17, %s1067_s17 }
  0x2a   :  { %51 = vadd.xlane.f32.xlu0 %v50_v8  ;;  %p1257_p4 = scmp.lt.s32.totalorder %s1255_s19, %s1251_s18 }
  0x2c   :  { %p1258_p5 = por %p1257_p4, %p1256_p3 }
  0x2e   :  { %76 = vadd.xlane.f32.xlu0 %v75_v10  ;;  %p1259_p6 = pnand %p1258_p5, %p1252_p2 }
  0x30   :  { %v1192_v9 = vpop.eup %1191 }
  0x31   :  { %1180 = vpush %v1192_v9 }
  0x62   :  { %s1181_s0 = spop %1180 }
  0x63   :  { %v81_v23 = vstv %s1181_s0 }
  0xb6   :  { %v61_v12 = vpop.xlane.xlu1 %60 }
  0xb7   :  { %v52_v13 = vpop.xlane.xlu0 %51  ;;  %v62_v14 = vmax.f32 %v61_v12, 1e-24 }
  0xb8   :  { %v53_v15 = vmax.f32 %v52_v13, 1e-24 }
  0xb9   :  { %1193 = vrsqrt.f32 %v62_v14 }
  0xba   :  { %1195 = vrsqrt.f32 %v53_v15 }
  0xbb   :  { %v77_v16 = vpop.xlane.xlu0 %76 }
  0xbc   :  { %v78_v17 = vmax.f32 %v77_v16, 1e-24 }
  0xbe   :  { %1197 = vrsqrt.f32 %v78_v17 }
  0xc3   :  { %v1194_v18 = vpop.eup %1193 }
  0xc4   :  { %v1196_v19 = vpop.eup %1195  ;;  %v64_v20 = vmul.f32 %v1194_v18, %v57_v1 }
  0xc5   :  { %v55_v21 = vmul.f32 %v1196_v19, %v47_v2 }
  0xc6   :  { %65 = vst.msk [vmem:[#allocation3] sm:$0xff] %vm49_vm0, %v64_v20 }
  0xc7   :  { %56 = vst.msk [vmem:[#allocation2] sm:$0xff] %vm49_vm0, %v55_v21 }
  0xc8   :  { %v1198_v22 = vpop.eup %1197 }
  0xc9   :  { %v80_v24 = vmul.f32 %v1198_v22, %v72_v3 }
  0xcb   :  { %v82_v25 = vmul.f32 %v81_v23, %v80_v24 }
  0xcd   :  { %v86_v26 = vsel %vm49_vm0, %v82_v25, 0  ;;  %v84_v28 = vld [vmem:[#allocation3] sm:$0xff] }
  0xce   :  { %v1351_v27 = vand.u32 4294901760, %v86_v26  ;;  %v83_v29 = vld [vmem:[#allocation2] sm:$0xff]  ;;  %v538_v30 = vsel %vm49_vm0, %v84_v28, 0  ;;  %v1354_v31 = vmul.f32 %v84_v28, %v82_v25 }
  0xcf   :  { %v89_v33 = vsel %vm49_vm0, %v83_v29, 0  ;;  %v541_v34 = vand.u32 4294901760, %v538_v30  ;;  %v1358_v35 = vmul.f32 %v83_v29, %v82_v25 }
  0xd0   :  { %v158_v32 = vsub.f32 %v86_v26, %v1351_v27  ;;  %v92_v36 = vand.u32 4294901760, %v89_v33  ;;  %v996_v0 = vsel %vm49_vm0, %v1354_v31, 0.0  ;;  %v999_v31 = vld [vmem:[#allocation4] sm:$0x1] }
  0xd1   :  { %1131 = vmatpush3.xpose.msra.mxu1 %v541_v34  ;;  %v618_v37 = vsub.f32 %v538_v30, %v541_v34  ;;  %v990_v1 = vsel %vm49_vm0, %v1358_v35, 0.0 }
  0xd2   :  { %v159_v38 = vand.u32 4294901760, %v158_v32  ;;  %1101 = vmatpush3.xpose.msra.mxu0 %v92_v36  ;;  %v169_v39 = vsub.f32 %v89_v33, %v92_v36  ;;  %1135 = vmatprep.subr.mxu1 %v1281_v11 }
  0xd3   :  { %1105 = vmatprep.subr.mxu0 %v1281_v11  ;;  %v619_v41 = vand.u32 4294901760, %v618_v37 }
  0xd4   :  { %v160_v40 = vsub.f32 %v158_v32, %v159_v38  ;;  %v170_v42 = vand.u32 4294901760, %v169_v39 }
  0xd5   :  { %v620_v44 = vsub.f32 %v618_v37, %v619_v41 }
  0xd6   :  { %v161_v43 = vand.u32 4294901760, %v160_v40  ;;  %v171_v45 = vsub.f32 %v169_v39, %v170_v42 }
  0xd7   :  { %v621_v46 = vand.u32 4294901760, %v620_v44 }
  0xd8   :  { %1103 = vmatmul.mubr.f32.vlgmr.msra.gmra.mrb[0].mxu0 %v161_v43  ;;  %1133 = vmatmul.mubr.f32.vlgmr.msra.gmra.mrb[0].mxu1 %v161_v43  ;;  %v172_v47 = vand.u32 4294901760, %v171_v45 }
  0xd9   :  { %1107 = vmatprep.mubr.msk.f32.mxu0 %vm1282_vm1, %v1281_v11  ;;  %1137 = vmatprep.mubr.msk.f32.mxu1 %vm1282_vm1, %v1281_v11 }
  0xda   :  { %1136 = vmatpush3.xpose.msra.mxu1 %v621_v46  ;;  %1106 = vmatpush3.xpose.msra.mxu0 %v172_v47 }
  0xdb   :  { %1140 = vmatprep.subr.mxu1 %v1281_v11  ;;  %1110 = vmatprep.subr.mxu0 %v1281_v11 }
  0xe0   :  { %1108 = vmatmul.mubr.f32.vlgmr.msra.gmra.mrb[0].mxu0 %v1351_v27  ;;  %1138 = vmatmul.mubr.f32.vlgmr.msra.gmra.mrb[0].mxu1 %v1351_v27 }
  0xe1   :  { %1111 = vmatpush3.xpose.msra.mxu0 %v169_v39  ;;  %1141 = vmatpush3.xpose.msra.mxu1 %v618_v37 }
  0xe2   :  { %1112 = vmatprep.mubr.msk.f32.mxu0 %vm1282_vm1, %v1281_v11  ;;  %1115 = vmatprep.subr.mxu0 %v1281_v11 }
  0xe3   :  { %1142 = vmatprep.mubr.msk.f32.mxu1 %vm1282_vm1, %v1281_v11  ;;  %1145 = vmatprep.subr.mxu1 %v1281_v11 }
  0xe8   :  { %1113 = vmatmul.mubr.f32.vlgmr.msra.gmra.mrb[0].mxu0 %v158_v32  ;;  %1143 = vmatmul.mubr.f32.vlgmr.msra.gmra.mrb[0].mxu1 %v158_v32 }
  0xe9   :  { %1116 = vmatpush3.xpose.msra.mxu0 %v92_v36  ;;  %1146 = vmatpush3.xpose.msra.mxu1 %v541_v34 }
  0xea   :  { %1117 = vmatprep.mubr.msk.f32.mxu0 %vm1282_vm1, %v1281_v11  ;;  %1120 = vmatprep.subr.mxu0 %v1281_v11 }
  0xeb   :  { %1147 = vmatprep.mubr.msk.f32.mxu1 %vm1282_vm1, %v1281_v11  ;;  %1150 = vmatprep.subr.mxu1 %v1281_v11 }
  0xf0   :  { %1118 = vmatmul.mubr.f32.vlgmr.msra.gmra.mrb[0].mxu0 %v159_v38  ;;  %1148 = vmatmul.mubr.f32.vlgmr.msra.gmra.mrb[0].mxu1 %v159_v38 }
  0xf1   :  { %1121 = vmatpush3.xpose.msra.mxu0 %v170_v42  ;;  %1151 = vmatpush3.xpose.msra.mxu1 %v619_v41 }
  0xf2   :  { %1122 = vmatprep.mubr.msk.f32.mxu0 %vm1282_vm1, %v1281_v11  ;;  %1125 = vmatprep.subr.mxu0 %v1281_v11 }
  0xf3   :  { %1152 = vmatprep.mubr.msk.f32.mxu1 %vm1282_vm1, %v1281_v11  ;;  %1155 = vmatprep.subr.mxu1 %v1281_v11 }
  0xf8   :  { %1123 = vmatmul.mubr.f32.vlgmr.msra.gmra.mrb[0].mxu0 %v1351_v27  ;;  %1153 = vmatmul.mubr.f32.vlgmr.msra.gmra.mrb[0].mxu1 %v1351_v27 }
  0xf9   :  { %1126 = vmatpush3.xpose.msra.mxu0 %v92_v36  ;;  %1156 = vmatpush3.xpose.msra.mxu1 %v541_v34 }
  0xfa   :  { %1127 = vmatprep.mubr.msk.f32.mxu0 %vm1282_vm1, %v1281_v11  ;;  %1157 = vmatprep.mubr.msk.f32.mxu1 %vm1282_vm1, %v1281_v11 }
 0x100   :  { %1128 = vmatmul.mubr.f32.vlgmr.msra.gmra.mrb[0].mxu0 %v1351_v27  ;;  %1158 = vmatmul.mubr.f32.vlgmr.msra.gmra.mrb[0].mxu1 %v1351_v27 }
 0x1d3   :  { %v533_v48 = vpop.f32.mrb[0].mxu0  ;;  %v982_v49 = vpop.f32.mrb[0].mxu1 }
 0x1d4   :  { %v1129_v50 = vpop.f32.mrb[1].mxu0  ;;  %v1159_v51 = vpop.f32.mrb[1].mxu1  ;;  %v1027_v52 = vsel %vm1000_vm2, %v982_v49, -inf  ;;  %v1001_v53 = vsel %vm1000_vm2, %v533_v48, -inf }
 0x1d5   :  { %1028 = vmax.xlane.f32.xlu0 %v1027_v52  ;;  %1002 = vmax.xlane.f32.xlu1 %v1001_v53 }
 0x262   :  { %v1029_v54 = vpop.xlane.xlu0 %1028  ;;  %v1003_v55 = vpop.xlane.xlu1 %1002 }
 0x263   :  { %v1030_v56 = vsub.f32 %v982_v49, %v1029_v54  ;;  %v1004_v57 = vsub.f32 %v533_v48, %v1003_v55 }
 0x265   :  { %v1031_v58 = vmul.f32 1.442695, %v1030_v56  ;;  %v1005_v59 = vmul.f32 1.442695, %v1004_v57 }
 0x267   :  { %1199 = vpow2.f32 %v1031_v58 }
 0x268   :  { %1201 = vpow2.f32 %v1005_v59 }
 0x271   :  { %v1200_v60 = vpop.eup %1199 }
 0x272   :  { %v1202_v61 = vpop.eup %1201  ;;  %v1033_v62 = vsel %vm1000_vm2, %v1200_v60, 0.0 }
 0x273   :  { %1034 = vadd.xlane.f32.xlu0 %v1033_v62  ;;  %v1007_v63 = vsel %vm1000_vm2, %v1202_v61, 0.0 }
 0x274   :  { %1008 = vadd.xlane.f32.xlu1 %v1007_v63 }
 0x277   :  { %997 = vadd.xlane.f32.xlu0 %v996_v0 }
 0x278   :  { %991 = vadd.xlane.f32.xlu1 %v990_v1 }
 0x300   :  { %v1035_v2 = vpop.xlane.xlu0 %1034 }
 0x301   :  { %1203 = vlog2.f32 %v1035_v2  ;;  %v1009_v3 = vpop.xlane.xlu1 %1008 }
 0x302   :  { %1205 = vlog2.f32 %v1009_v3 }
 0x304   :  { %v998_v9 = vpop.xlane.xlu0 %997 }
 0x305   :  { %v992_v13 = vpop.xlane.xlu1 %991 }
 0x30b   :  { %v1204_v4 = vpop.eup %1203 }
 0x30c   :  { %v1206_v5 = vpop.eup %1205  ;;  %v1037_v6 = vmul.f32 0.6931472, %v1204_v4 }
 0x30d   :  { %v1011_v7 = vmul.f32 0.6931472, %v1206_v5 }
 0x30e   :  { %v1038_v8 = vadd.f32 %v1037_v6, %v1029_v54 }
 0x30f   :  { %v1012_v10 = vadd.f32 %v1011_v7, %v1003_v55 }
 0x310   :  { %v1039_v12 = vsub.f32 %v1038_v8, %v998_v9 }
 0x311   :  { %v1013_v14 = vsub.f32 %v1012_v10, %v992_v13 }
 0x312   :  { %v1040_v15 = vsel %vm1014_vm3, %v1039_v12, 0.0 }
 0x313   :  { %1041 = vadd.xlane.f32.xlu0 %v1040_v15  ;;  %v1015_v16 = vsel %vm1014_vm3, %v1013_v14, 0.0 }
 0x314   :  { %1016 = vadd.xlane.f32.xlu1 %v1015_v16 }
 0x3a0   :  { %v1042_v17 = vpop.xlane.xlu0 %1041 }
 0x3a1   :  { %v1043_v18 = vrot.slane %v1042_v17, 4  ;;  %v1017_v19 = vpop.xlane.xlu1 %1016 }
 0x3a2   :  { %v1018_v20 = vrot.slane %v1017_v19, 4 }
 0x3a3   :  { %v1044_v21 = vadd.f32 %v1043_v18, %v1042_v17 }
 0x3a4   :  { %v1019_v22 = vadd.f32 %v1018_v20, %v1017_v19 }
 0x3a5   :  { %v1045_v23 = vrot.slane %v1044_v21, 2 }
 0x3a6   :  { %v1020_v24 = vrot.slane %v1019_v22, 2 }
 0x3a7   :  { %v1046_v25 = vadd.f32 %v1045_v23, %v1044_v21 }
 0x3a8   :  { %v1021_v26 = vadd.f32 %v1020_v24, %v1019_v22 }
 0x3a9   :  { %v1047_v27 = vrot.slane %v1046_v25, 1 }
 0x3aa   :  { %v1022_v28 = vrot.slane %v1021_v26, 1 }
 0x3ab   :  { %v1048_v29 = vadd.f32 %v1047_v27, %v1046_v25 }
 0x3ac   :  { %v1023_v30 = vadd.f32 %v1022_v28, %v1021_v26 }
 0x3ae   :  { %1182 = vpush %v1023_v30 }
 0x3af   :  { %1184 = vpush %v1048_v29 }
 0x3df   :  { %s1183_s2 = spop %1182 }
 0x3e0   :  { %v1025_v32 = vstv %s1183_s2  ;;  %s1185_s3 = spop %1184 }
 0x3e1   :  { %v1026_v11 = vadd.f32 %v1025_v32, %v999_v31  ;;  %v1050_v33 = vstv %s1185_s3 }
 0x3e3   :  { %v1051_v34 = vadd.f32 %v1050_v33, %v1026_v11 }
 0x3e5   :  { %1053 = vst.msk [vmem:[#allocation4] sm:$0x1] %vm66_vm4, %v1051_v34 }
 0x3ec   :  { %v1057_v35 = vld [vmem:[#allocation4] sm:$0x1] }
 0x3ed   :  { %v1058_v36 = vmul.f32 0.125, %v1057_v35 }
 0x3ef   :  { %1059 = vst.msk [vmem:[#allocation11] sm:$0x1] %vm66_vm4, %v1058_v36 }
 0x3f0   :  { %1262 = shalt.err (!%p1259_p6)
}
 0x3f1   :  { %s1263_s22 = scalar_lea.hbm %s1424_s4, 16 }
 0x3f2   :  { %p1264_p7 = scmp.ne.s32.totalorder %s1424_s4, %s1263_s22  ;;  %p1267_p8 = scmp.lt.u32.totalorder %s1263_s22, %s1424_s4 }
 0x3f4   :  { %p1269_p9 = pnand %p1267_p8, %p1264_p7 }
 0x3f6   :  { %1272 = shalt.err (!%p1269_p9)
}
 0x3f7   :  { %1069 = dma.vmem_to_hbm [thread:$0]  %s1067_s17, 16, %s1424_s4, [#allocation8]  }
 0x3f8   :  { %1277 = dma.done.wait [#allocation8], 16  }
 0x3f9   :  { %1278 = vsyncadd [#allocation8], 4294967280 }
 0x3fa   :  { %1073 = vsyncpa [#allocation7], 1 }
 0x3fb   :  { %1074 = vsyncpa [#allocation10], 1 }
 0x3fc   :  { %1075 = vsyncpa [#allocation8], 1 }

</bundles_post_ra>
